<compile_context>
chip_gen: v7x
topology: tpu7x:2x2x1
jax: 0.10.0
libtpu: 0.0.40
codegen_flags: <defaults>
</compile_context>

<pallas_src>
import functools

import jax
import jax.numpy as jnp
from jax.experimental import pallas as pl
from jax.experimental.pallas import tpu as pltpu


def _round_up(x, m):
    return ((x + m - 1) // m) * m


# ----------------------------------------------------------------------------
# Pallas kernel: fused forward for both Q heads.
# ----------------------------------------------------------------------------
def _double_q_kernel(n_mid, h_pad, headwise, *refs):
    """refs = (x_ref,                     # (TILE_B, in_dim) f32, obs||action
               w0_ref,                    # (in_dim, 2H) bf16
               [w_mid_ref],               # iff n_mid > 0:
                                          #   block-diag: (n_mid, 2H, 2H) bf16
                                          #   head-wise : (n_mid, 2, H, H) bf16
               w_last_t_ref,              # (8, 2H) bf16 (row0=q1 | row1=q2)
               b_hid_ref,                 # (n_mid+1, 2H) f32 hidden biases
               b_last_ref,                # (8, 1) f32 final bias column
               out_ref)                   # (8, TILE_B) f32 transposed output
    """
    x_ref, w0_ref = refs[0], refs[1]
    idx = 2
    w_mid_ref = None
    if n_mid > 0:
        w_mid_ref = refs[idx]
        idx += 1
    w_last_t_ref, b_hid_ref, b_last_ref, out_ref = refs[idx:idx + 4]

    b_hid = b_hid_ref[...]                       # (n_mid+1, 2H) f32
    x = x_ref[...].astype(jnp.bfloat16)

    # Layer 0: single K-dim dot on the concatenated input; both heads fused on N.
    h = jnp.dot(x, w0_ref[...], preferred_element_type=jnp.float32) + b_hid[0:1, :]
    h = jnp.maximum(h, 0.0)

    if not headwise:
        # Middle layers: block-diagonal fused (2H, 2H) weights (2H <= 256).
        for l in range(n_mid):
            h = (jnp.dot(h.astype(jnp.bfloat16), w_mid_ref[l],
                         preferred_element_type=jnp.float32)
                 + b_hid[l + 1:l + 2, :])
            h = jnp.maximum(h, 0.0)
        # Final layer, transposed: (8, 2H) x (TILE_B, 2H)^T -> (8, TILE_B).
        out = jax.lax.dot_general(
            w_last_t_ref[...], h.astype(jnp.bfloat16),
            dimension_numbers=(((1,), (1,)), ((), ())),
            preferred_element_type=jnp.float32)
    else:
        # Middle layers: per-head (H, H) dots — no zero-block FLOPs.
        h1 = h[:, :h_pad]
        h2 = h[:, h_pad:]
        for l in range(n_mid):
            h1 = jnp.maximum(
                jnp.dot(h1.astype(jnp.bfloat16), w_mid_ref[l, 0],
                        preferred_element_type=jnp.float32)
                + b_hid[l + 1:l + 2, :h_pad], 0.0)
            h2 = jnp.maximum(
                jnp.dot(h2.astype(jnp.bfloat16), w_mid_ref[l, 1],
                        preferred_element_type=jnp.float32)
                + b_hid[l + 1:l + 2, h_pad:], 0.0)
        out = (jax.lax.dot_general(
                   w_last_t_ref[:, :h_pad], h1.astype(jnp.bfloat16),
                   dimension_numbers=(((1,), (1,)), ((), ())),
                   preferred_element_type=jnp.float32)
               + jax.lax.dot_general(
                   w_last_t_ref[:, h_pad:], h2.astype(jnp.bfloat16),
                   dimension_numbers=(((1,), (1,)), ((), ())),
                   preferred_element_type=jnp.float32))

    out_ref[...] = (out + b_last_ref[...]).astype(out_ref.dtype)


# ----------------------------------------------------------------------------
# Parameter construction (deterministic, matches utils.mlp layer shapes).
# ----------------------------------------------------------------------------
def make_mlp_params(key, in_dim, hidden_dim, out_dim, hidden_depth):
    """Returns flat list [W0, b0, W1, b1, ...] with W stored as (in, out)."""
    if hidden_depth == 0:
        dims = [(in_dim, out_dim)]
    else:
        dims = [(in_dim, hidden_dim)]
        dims += [(hidden_dim, hidden_dim)] * (hidden_depth - 1)
        dims += [(hidden_dim, out_dim)]
    params = []
    for i, (d_in, d_out) in enumerate(dims):
        k = jax.random.fold_in(key, i)
        kw, kb = jax.random.split(k)
        # TODO(synk): utils.weight_init uses orthogonal init; scaled normal is a
        # deterministic stand-in here (not a checkpoint load).
        w = jax.random.normal(kw, (d_in, d_out), dtype=jnp.float32) / jnp.sqrt(d_in)
        b = 0.1 * jax.random.normal(kb, (1, d_out), dtype=jnp.float32)
        params += [w, b]
    return params


def _block_diag(a, b):
    ra, ca = a.shape
    rb, cb = b.shape
    top = jnp.concatenate([a, jnp.zeros((ra, cb), a.dtype)], axis=1)
    bot = jnp.concatenate([jnp.zeros((rb, ca), b.dtype), b], axis=1)
    return jnp.concatenate([top, bot], axis=0)


def fuse_double_q_params(q1_params, q2_params, obs_dim, action_dim):
    """Fuse both heads' per-layer params into a few packed bf16 kernel operands."""
    assert len(q1_params) == len(q2_params)
    n_layers = len(q1_params) // 2
    assert n_layers >= 2, "hidden_depth >= 1 required"
    # TODO(synk): hidden_depth == 0 (single Linear, no ReLU) path not implemented.
    for l in range(n_layers):
        assert q1_params[2 * l].shape == q2_params[2 * l].shape
        assert q1_params[2 * l + 1].shape == q2_params[2 * l + 1].shape
    in_dim = q1_params[0].shape[0]
    assert in_dim == obs_dim + action_dim, "W0 input dim must equal obs_dim+action_dim"

    hidden = q1_params[0].shape[1]
    n_mid = n_layers - 2

    # Lane-dense padding of the per-head hidden width.  Block-diag fusion only
    # while the fused width fits one MXU tile (2H <= 256); otherwise head-wise.
    h_pad_bd = max(64, _round_up(hidden, 64))
    headwise = (2 * h_pad_bd) > 256
    h_pad = _round_up(hidden, 128) if headwise else h_pad_bd
    two_h = 2 * h_pad

    def pad_w(w, rows, cols):
        return jnp.pad(w, ((0, rows - w.shape[0]), (0, cols - w.shape[1])))

    # Layer 0: both heads concatenated along the output (N) dim.
    w0 = jnp.concatenate(
        [pad_w(q1_params[0], in_dim, h_pad), pad_w(q2_params[0], in_dim, h_pad)],
        axis=1).astype(jnp.bfloat16)                                  # (in, 2H)

    # Middle layers.
    if n_mid > 0:
        mids = []
        for l in range(1, n_layers - 1):
            w1 = pad_w(q1_params[2 * l], h_pad, h_pad)
            w2 = pad_w(q2_params[2 * l], h_pad, h_pad)
            if headwise:
                mids.append(jnp.stack([w1, w2], axis=0))              # (2, H, H)
            else:
                mids.append(_block_diag(w1, w2))                      # (2H, 2H)
        w_mid = jnp.stack(mids, axis=0).astype(jnp.bfloat16)
    else:
        w_mid = None

    # Final layer, transposed + padded to 8 sublanes:
    # row 0 = q1 weights over cols [0, H), row 1 = q2 weights over cols [H, 2H).
    w1_last = pad_w(q1_params[-2], h_pad, 1)                          # (H, 1)
    w2_last = pad_w(q2_params[-2], h_pad, 1)
    w_last_t = jnp.zeros((8, two_h), jnp.float32)
    w_last_t = w_last_t.at[0, :h_pad].set(w1_last[:, 0])
    w_last_t = w_last_t.at[1, h_pad:].set(w2_last[:, 0])
    w_last_t = w_last_t.astype(jnp.bfloat16)

    # Hidden-layer biases packed into one (n_mid+1, 2H) f32 buffer.
    b_rows = []
    for l in range(n_layers - 1):
        b1 = pad_w(q1_params[2 * l + 1], 1, h_pad)
        b2 = pad_w(q2_params[2 * l + 1], 1, h_pad)
        b_rows.append(jnp.concatenate([b1, b2], axis=1))
    b_hid = jnp.concatenate(b_rows, axis=0)

    # Final bias as an (8, 1) column for the transposed (8, B) output.
    b_last = jnp.zeros((8, 1), jnp.float32)
    b_last = b_last.at[0, 0].set(q1_params[-1][0, 0])
    b_last = b_last.at[1, 0].set(q2_params[-1][0, 0])

    return dict(in_dim=in_dim, h_pad=h_pad, n_mid=n_mid, headwise=headwise,
                w0=w0, w_mid=w_mid, w_last_t=w_last_t, b_hid=b_hid, b_last=b_last)


# ----------------------------------------------------------------------------
# Wrapper: batch-tiled fused Pallas kernel call.
# ----------------------------------------------------------------------------
def _pick_tile_b(batch):
    if batch < 256:
        return batch                     # single tile (keeps output lane-legal)
    # >= 2 grid steps so the "parallel" axis feeds both v7x TensorCores;
    # 128-aligned lane-dense tiles, capped at 512 rows.
    return min(512, _round_up(pl.cdiv(batch, 2), 128))


def double_q_critic_forward(obs, action, fused):
    assert obs.shape[0] == action.shape[0]
    batch = obs.shape[0]
    in_dim, h_pad, n_mid = fused["in_dim"], fused["h_pad"], fused["n_mid"]
    headwise = fused["headwise"]
    two_h = 2 * h_pad
    assert obs.shape[1] + action.shape[1] == in_dim

    # Single concatenated input (matches torch.cat) -> one K pass on layer 0.
    x = jnp.concatenate([obs, action], axis=-1).astype(jnp.float32)

    tile_b = _pick_tile_b(batch)
    grid = (pl.cdiv(batch, tile_b),)

    def _const_spec(arr):
        nd = arr.ndim
        # Grid-invariant block: constant index_map, single-buffered (no point
        # double-buffering a weight that never changes).
        return pl.BlockSpec(arr.shape, lambda i, _n=nd: (0,) * _n,
                            pipeline_mode=pl.Buffered(1))

    inputs = [x, fused["w0"]]
    in_specs = [pl.BlockSpec((tile_b, in_dim), lambda i: (i, 0)),
                _const_spec(fused["w0"])]
    if n_mid > 0:
        inputs.append(fused["w_mid"])
        in_specs.append(_const_spec(fused["w_mid"]))
    inputs += [fused["w_last_t"], fused["b_hid"], fused["b_last"]]
    in_specs += [_const_spec(fused["w_last_t"]),
                 _const_spec(fused["b_hid"]),
                 _const_spec(fused["b_last"])]

    # VMEM budget: bf16 weights single-buffered + double-buffered x/out tiles
    # + live f32/bf16 activation copies.  Clamp below the v7x 64 MiB physical.
    w_bytes = (fused["w0"].size + fused["w_last_t"].size
               + (0 if n_mid == 0 else fused["w_mid"].size)) * 2
    b_bytes = (fused["b_hid"].size + fused["b_last"].size) * 4
    act_bytes = 2 * tile_b * in_dim * 4 + 2 * 8 * tile_b * 4 + 4 * tile_b * two_h * 4
    vmem_limit = int(min(max((w_bytes + b_bytes + act_bytes) * 3 // 2 + (2 << 20),
                             32 << 20), 56 << 20))

    mid_flops = (2 * 2 * h_pad * h_pad) if headwise else (2 * two_h * two_h)
    flops = batch * (2 * in_dim * two_h + n_mid * mid_flops + 2 * two_h * 8)
    bytes_accessed = x.size * 4 + w_bytes + b_bytes + 8 * batch * 4
    cost = pl.CostEstimate(flops=flops, transcendentals=0,
                           bytes_accessed=bytes_accessed)

    out = pl.pallas_call(
        functools.partial(_double_q_kernel, n_mid, h_pad, headwise),
        out_shape=jax.ShapeDtypeStruct((8, batch), jnp.float32),
        grid=grid,
        in_specs=in_specs,
        out_specs=pl.BlockSpec((8, tile_b), lambda i: (0, i)),
        compiler_params=pltpu.CompilerParams(
            dimension_semantics=("parallel",),
            vmem_limit_bytes=vmem_limit),
        cost_estimate=cost,
    )(*inputs)

    # q1 / q2 live in sublane rows 0 / 1 of the (8, B) transposed output slab.
    return out[0][:, None], out[1][:, None]


# ----------------------------------------------------------------------------
# Pure-JAX reference for a sanity check.
# ----------------------------------------------------------------------------
def _ref_mlp(x, params):
    n_layers = len(params) // 2
    h = x
    for layer in range(n_layers):
        h = h @ params[2 * layer] + params[2 * layer + 1]
        if layer < n_layers - 1:
            h = jnp.maximum(h, 0.0)
    return h


if __name__ == "__main__":
    key = jax.random.PRNGKey(0)

    def _run_case(case_idx, batch, obs_dim, action_dim, hidden_dim, hidden_depth):
        kk = jax.random.fold_in(key, case_idx)
        k_obs, k_act, k_q1, k_q2 = jax.random.split(kk, 4)
        obs = jax.random.normal(k_obs, (batch, obs_dim), dtype=jnp.float32)
        action = jax.random.normal(k_act, (batch, action_dim), dtype=jnp.float32)

        q1_params = make_mlp_params(k_q1, obs_dim + action_dim, hidden_dim, 1,
                                    hidden_depth)
        q2_params = make_mlp_params(k_q2, obs_dim + action_dim, hidden_dim, 1,
                                    hidden_depth)
        fused = fuse_double_q_params(q1_params, q2_params, obs_dim, action_dim)

        q1, q2 = double_q_critic_forward(obs, action, fused)
        jax.block_until_ready((q1, q2))

        x = jnp.concatenate([obs, action], axis=-1)
        q1_ref = _ref_mlp(x, q1_params)
        q2_ref = _ref_mlp(x, q2_params)
        assert q1.shape == (batch, 1) and q2.shape == (batch, 1)
        # bf16 MXU operands with f32 accumulation -> looser tolerance than f32.
        assert jnp.allclose(q1, q1_ref, atol=3e-2, rtol=3e-2), (
            "q1 mismatch", case_idx, float(jnp.max(jnp.abs(q1 - q1_ref))))
        assert jnp.allclose(q2, q2_ref, atol=3e-2, rtol=3e-2), (
            "q2 mismatch", case_idx, float(jnp.max(jnp.abs(q2 - q2_ref))))

    # 1) block-diag fused path, single batch tile (hidden=32 -> padded 2H=128).
    _run_case(0, batch=8, obs_dim=24, action_dim=8, hidden_dim=32, hidden_depth=2)
    # 2) head-wise path, multi-tile "parallel" grid with a ragged last tile.
    _run_case(1, batch=300, obs_dim=17, action_dim=6, hidden_dim=160, hidden_depth=3)
    # 3) no middle layers (hidden_depth=1), block-diag final only.
    _run_case(2, batch=16, obs_dim=5, action_dim=3, hidden_dim=64, hidden_depth=1)

    print("KERNEL_OK")
</pallas_src>

<mosaic_0001>
module attributes {stable_mosaic.version = 11 : i64} {
  func.func @_double_q_kernel(%arg0: i32, %arg1: memref<8x32xf32, #tpu.memory_space<vmem>>, %arg2: memref<32x128xbf16, #tpu.memory_space<vmem>>, %arg3: memref<1x128x128xbf16, #tpu.memory_space<vmem>>, %arg4: memref<8x128xbf16, #tpu.memory_space<vmem>>, %arg5: memref<2x128xf32, #tpu.memory_space<vmem>>, %arg6: memref<8x1xf32, #tpu.memory_space<vmem>>, %arg7: memref<8x8xf32, #tpu.memory_space<vmem>>) attributes {dimension_semantics = [#tpu.dimension_semantics<parallel>], iteration_bounds = array<i64: 1>, scalar_prefetch = 0 : i64, scratch_operands = 0 : i64, tpu.core_type = #tpu.core_type<tc>, window_params = [{transform_indices = @transform_0, window_bounds = array<i64: 8, 32>}, {pipeline_mode = #tpu.pipeline_mode<synchronous>, transform_indices = @transform_1, window_bounds = array<i64: 32, 128>}, {pipeline_mode = #tpu.pipeline_mode<synchronous>, transform_indices = @transform_2, window_bounds = array<i64: 1, 128, 128>}, {pipeline_mode = #tpu.pipeline_mode<synchronous>, transform_indices = @transform_3, window_bounds = array<i64: 8, 128>}, {pipeline_mode = #tpu.pipeline_mode<synchronous>, transform_indices = @transform_4, window_bounds = array<i64: 2, 128>}, {pipeline_mode = #tpu.pipeline_mode<synchronous>, transform_indices = @transform_5, window_bounds = array<i64: 8, 1>}, {transform_indices = @transform_6, window_bounds = array<i64: 8, 8>}]} {
    %c0 = arith.constant 0 : index
    %c0_0 = arith.constant 0 : index
    %0 = vector.load %arg5[%c0, %c0_0] : memref<2x128xf32, #tpu.memory_space<vmem>>, vector<2x128xf32>
    %c0_1 = arith.constant 0 : index
    %c0_2 = arith.constant 0 : index
    %1 = vector.load %arg1[%c0_1, %c0_2] : memref<8x32xf32, #tpu.memory_space<vmem>>, vector<8x32xf32>
    %2 = arith.truncf %1 : vector<8x32xf32> to vector<8x32xbf16>
    %c0_3 = arith.constant 0 : index
    %c0_4 = arith.constant 0 : index
    %3 = vector.load %arg2[%c0_3, %c0_4] : memref<32x128xbf16, #tpu.memory_space<vmem>>, vector<32x128xbf16>
    %cst = arith.constant dense<0.000000e+00> : vector<8x128xf32>
    %4 = tpu.matmul %2, %3, %cst {dimension_numbers = #tpu.dot_dimension_numbers<[1], [0], [0], [1], [0, 0, 1, 1], [], []>} : vector<8x32xbf16>, vector<32x128xbf16>, vector<8x128xf32> -> vector<8x128xf32>
    %5 = vector.extract_strided_slice %0 {offsets = [0, 0], sizes = [1, 128], strides = [1, 1]} : vector<2x128xf32> to vector<1x128xf32>
    %6 = vector.broadcast %5 : vector<1x128xf32> to vector<8x128xf32>
    %7 = arith.addf %4, %6 : vector<8x128xf32>
    %cst_5 = arith.constant 0.000000e+00 : f32
    %8 = vector.broadcast %cst_5 : f32 to vector<8x128xf32>
    %9 = arith.maximumf %7, %8 : vector<8x128xf32>
    %10 = arith.truncf %9 : vector<8x128xf32> to vector<8x128xbf16>
    %c0_6 = arith.constant 0 : index
    %c0_7 = arith.constant 0 : index
    %c0_8 = arith.constant 0 : index
    %11 = vector.load %arg3[%c0_6, %c0_7, %c0_8] : memref<1x128x128xbf16, #tpu.memory_space<vmem>>, vector<1x128x128xbf16>
    %12 = vector.shape_cast %11 : vector<1x128x128xbf16> to vector<128x128xbf16>
    %cst_9 = arith.constant dense<0.000000e+00> : vector<8x128xf32>
    %13 = tpu.matmul %10, %12, %cst_9 {dimension_numbers = #tpu.dot_dimension_numbers<[1], [0], [0], [1], [0, 0, 1, 1], [], []>} : vector<8x128xbf16>, vector<128x128xbf16>, vector<8x128xf32> -> vector<8x128xf32>
    %14 = vector.extract_strided_slice %0 {offsets = [1, 0], sizes = [1, 128], strides = [1, 1]} : vector<2x128xf32> to vector<1x128xf32>
    %15 = vector.broadcast %14 : vector<1x128xf32> to vector<8x128xf32>
    %16 = arith.addf %13, %15 : vector<8x128xf32>
    %cst_10 = arith.constant 0.000000e+00 : f32
    %17 = vector.broadcast %cst_10 : f32 to vector<8x128xf32>
    %18 = arith.maximumf %16, %17 : vector<8x128xf32>
    %c0_11 = arith.constant 0 : index
    %c0_12 = arith.constant 0 : index
    %19 = vector.load %arg4[%c0_11, %c0_12] : memref<8x128xbf16, #tpu.memory_space<vmem>>, vector<8x128xbf16>
    %20 = arith.truncf %18 : vector<8x128xf32> to vector<8x128xbf16>
    %cst_13 = arith.constant dense<0.000000e+00> : vector<8x8xf32>
    %21 = tpu.matmul %19, %20, %cst_13 {dimension_numbers = #tpu.dot_dimension_numbers<[1], [1], [0], [0], [0, 0, 1, 0], [], []>} : vector<8x128xbf16>, vector<8x128xbf16>, vector<8x8xf32> -> vector<8x8xf32>
    %c0_14 = arith.constant 0 : index
    %c0_15 = arith.constant 0 : index
    %22 = vector.load %arg6[%c0_14, %c0_15] : memref<8x1xf32, #tpu.memory_space<vmem>>, vector<8x1xf32>
    %23 = vector.broadcast %22 : vector<8x1xf32> to vector<8x8xf32>
    %24 = arith.addf %21, %23 : vector<8x8xf32>
    %c0_16 = arith.constant 0 : index
    %c0_17 = arith.constant 0 : index
    %25 = vector.load %arg7[%c0_16, %c0_17] : memref<8x8xf32, #tpu.memory_space<vmem>>, vector<8x8xf32>
    tpu.vector_store %arg7[%c0_16, %c0_17], %24 {strides = array<i32>} : memref<8x8xf32, #tpu.memory_space<vmem>>, vector<8x8xf32>,
    return
  }
  func.func @transform_0(%arg0: i32) -> (i32, i32) {
    %c0_i32 = arith.constant 0 : i32
    %c0_i32_0 = arith.constant 0 : i32
    return %arg0, %c0_i32 : i32, i32
  }
  func.func @transform_1(%arg0: i32) -> (i32, i32) {
    %c0_i32 = arith.constant 0 : i32
    %c0_i32_0 = arith.constant 0 : i32
    %c0_i32_1 = arith.constant 0 : i32
    return %c0_i32, %c0_i32_0 : i32, i32
  }
  func.func @transform_2(%arg0: i32) -> (i32, i32, i32) {
    %c0_i32 = arith.constant 0 : i32
    %c0_i32_0 = arith.constant 0 : i32
    %c0_i32_1 = arith.constant 0 : i32
    %c0_i32_2 = arith.constant 0 : i32
    return %c0_i32, %c0_i32_0, %c0_i32_1 : i32, i32, i32
  }
  func.func @transform_3(%arg0: i32) -> (i32, i32) {
    %c0_i32 = arith.constant 0 : i32
    %c0_i32_0 = arith.constant 0 : i32
    %c0_i32_1 = arith.constant 0 : i32
    return %c0_i32, %c0_i32_0 : i32, i32
  }
  func.func @transform_4(%arg0: i32) -> (i32, i32) {
    %c0_i32 = arith.constant 0 : i32
    %c0_i32_0 = arith.constant 0 : i32
    %c0_i32_1 = arith.constant 0 : i32
    return %c0_i32, %c0_i32_0 : i32, i32
  }
  func.func @transform_5(%arg0: i32) -> (i32, i32) {
    %c0_i32 = arith.constant 0 : i32
    %c0_i32_0 = arith.constant 0 : i32
    %c0_i32_1 = arith.constant 0 : i32
    return %c0_i32, %c0_i32_0 : i32, i32
  }
  func.func @transform_6(%arg0: i32) -> (i32, i32) {
    %c0_i32 = arith.constant 0 : i32
    %c0_i32_0 = arith.constant 0 : i32
    return %c0_i32, %arg0 : i32, i32
  }
}

</mosaic_0001>

<bundles_post_ra>
// kernel: tpu_custom_call.1
= control target key start
LH: loop header
LB: loop body
LE: loop exit
PB: predicated region body
PF: predicated region fallthrough
CT: control target
= control target key end

     0   :  { %11 = vsyncpa [#allocation3], 0  ;;  %s541_s0 = inlined_call_operand.vmem [shape: f32[8,32], index: 0, kind: input, shape index: {}]   ;;  %s542_s1 = inlined_call_operand.hbm [shape: bf16[32,128], index: 1, kind: input, shape index: {}]   ;;  %s543_s2 = inlined_call_operand.hbm [shape: bf16[1,128,128], index: 2, kind: input, shape index: {}]   ;;  %s544_s3 = inlined_call_operand.vmem [shape: bf16[8,128], index: 3, kind: input, shape index: {}]   ;;  %s545_s4 = inlined_call_operand.vmem [shape: f32[2,128], index: 4, kind: input, shape index: {}]   ;;  %s546_s5 = inlined_call_operand.vmem [shape: f32[8,1], index: 5, kind: input, shape index: {}]   ;;  %s547_s6 = inlined_call_operand.hbm [shape: f32[8,8], index: 6, kind: output, shape index: {}]  }
   0x1   :  { %12 = vsyncpa [#allocation6], 0 }
   0x2   :  { %13 = vsyncpa [#allocation4], 0  ;;  %s447_s21 = smov [#allocation2]   ;;  %s375_s25 = scalar_lea.hbm %s542_s1, 256 }
   0x3   :  { %s21_s22 = sshll.u32 %s447_s21, 4  ;;  %p376_p0 = scmp.ne.s32.totalorder %s542_s1, %s375_s25  ;;  %s22_s22 = int_to_ptr.vmem [resolvable:$true] %s21_s22 }
   0x4   :  { %p379_p1 = scmp.lt.u32.totalorder %s375_s25, %s542_s1 }
   0x6   :  { %p381_p2 = pnand %p379_p1, %p376_p0 }
   0x8   :  { %384 = shalt.err (!%p381_p2)
}
   0x9   :  { %s385_s30 = scalar_lea.vmem %s22_s22, 256  ;;  %p390_p4 = scmp.lt.s32.totalorder %s22_s22, %s22_s22 }
   0xa   :  { %p386_p3 = scmp.ne.s32.totalorder %s22_s22, %s385_s30  ;;  %p391_p5 = scmp.lt.s32.totalorder %s385_s30, %s385_s30 }
   0xc   :  { %p392_p6 = por %p391_p5, %p390_p4 }
   0xe   :  { %p393_p7 = pnand %p392_p6, %p386_p3 }
  0x10   :  { %396 = shalt.err (!%p393_p7)
}
  0x11   :  { %s448_s7 = smov 64   ;;  %s449_s8 = smov 4  }
  0x12   :  { %27 = dma.hbm_to_vmem [thread:$0]  %s542_s1, 256, %s22_s22, [#allocation3], %s448_s7, %s448_s7, %s449_s8  }
  0x13   :  { %s450_s11 = smov [#allocation5]   ;;  %s397_s15 = scalar_lea.hbm %s543_s2, 1024 }
  0x14   :  { %s33_s12 = sshll.u32 %s450_s11, 4  ;;  %p398_p8 = scmp.ne.s32.totalorder %s543_s2, %s397_s15  ;;  %s34_s12 = int_to_ptr.vmem [resolvable:$true] %s33_s12 }
  0x15   :  { %p401_p9 = scmp.lt.u32.totalorder %s397_s15, %s543_s2 }
  0x17   :  { %p403_p10 = pnand %p401_p9, %p398_p8 }
  0x19   :  { %406 = shalt.err (!%p403_p10)
}
  0x1a   :  { %s407_s20 = scalar_lea.vmem %s34_s12, 1024  ;;  %p412_p12 = scmp.lt.s32.totalorder %s34_s12, %s34_s12 }
  0x1b   :  { %p408_p11 = scmp.ne.s32.totalorder %s34_s12, %s407_s20  ;;  %p413_p13 = scmp.lt.s32.totalorder %s407_s20, %s407_s20 }
  0x1d   :  { %p414_p0 = por %p413_p13, %p412_p12 }
  0x1f   :  { %p415_p1 = pnand %p414_p0, %p408_p11 }
  0x21   :  { %418 = shalt.err (!%p415_p1)
}
  0x22   :  { %39 = dma.hbm_to_vmem [thread:$0]  %s543_s2, 1024, %s34_s12, [#allocation6], %s448_s7, %s448_s7, %s449_s8  }
  0x23   :  { %441 = dma.done.wait [#allocation3], 256  }
  0x24   :  { %442 = vsyncadd [#allocation3], 4294967040 }
  0x25   :  { %443 = dma.done.wait [#allocation6], 1024  }
  0x26   :  { %444 = vsyncadd [#allocation6], 4294966272  ;;  %v451_v0 = vmov 0.0   ;;  %vm452_vm0 = vmmov 0   ;;  %v365_v1 = vld [vmem:[#allocation2] sm:$0xff]   ;;  %v366_v2 = vld [vmem:[#allocation2 + $0x8] sm:$0xff]   ;;  %v60_v13 = vlaneseq }
  0x27   :  { %322 = vmatprep.subr.bf16.mxu0 %v451_v0  ;;  %326 = vmatprep.mubr.msk.bf16.mxu0 %vm452_vm0, %v451_v0  ;;  %v54_v3 = vld [vmem:[%s541_s0] sm:$0xff]  ;;  %v367_v4 = vld [vmem:[#allocation5] sm:$0xff]   ;;  %v368_v6 = vld [vmem:[#allocation5 + $0x8] sm:$0xff]   ;;  %vm76_vm1 = vcmask 261120   ;;  %v453_v26 = vmov 0   ;;  %vm279_vm2 = vcmask 64512  }
  0x28   :  { %330 = vmatprep.subr.bf16.mxu1 %v451_v0  ;;  %346 = vmatprep.mubr.msk.bf16.mxu1 %vm452_vm0, %v451_v0  ;;  %v55_v5 = vpack.c.bf16 %v54_v3, %v54_v3  ;;  %v369_v7 = vld [vmem:[#allocation5 + $0x10] sm:$0xff]   ;;  %v370_v8 = vld [vmem:[#allocation5 + $0x18] sm:$0xff]   ;;  %v371_v9 = vld [vmem:[#allocation5 + $0x20] sm:$0xff]   ;;  %v61_v14 = vshrl.u32 %v60_v13, 7 }
  0x29   :  { %323 = vmatpush3.bf16.msra.mxu0 %v365_v1  ;;  %331 = vmatpush3.bf16.msra.mxu1 %v367_v4  ;;  %v372_v10 = vld [vmem:[#allocation5 + $0x28] sm:$0xff]   ;;  %v373_v11 = vld [vmem:[#allocation5 + $0x30] sm:$0xff]   ;;  %v374_v12 = vld [vmem:[#allocation5 + $0x38] sm:$0xff]  }
  0x2a   :  { %324 = vmatprep.subr.bf16.mxu0 %v451_v0  ;;  %332 = vmatprep.subr.bf16.mxu1 %v451_v0  ;;  %v62_v15 = vsub.s32 0, %v61_v14  ;;  %v53_v16 = vld [vmem:[%s545_s4] sm:$0x3]  ;;  %v140_v27 = vsub.s32 1, %v61_v14 }
  0x2b   :  { %v233_v25 = vld [vmem:[%s546_s5] sm:$0xff]  ;;  %364 = vset.pattern.permute.xlu0 %v453_v26  ;;  %s454_s5 = smov [#allocation7]  }
  0x2c   :  { %v63_v17 = vrot.slane %v53_v16, %v62_v15  ;;  %236 = vperm.xlu0 %364, %v233_v25   ;;  %v141_v28 = vrot.slane %v53_v16, %v140_v27  ;;  %v231_v36 = vld [vmem:[%s544_s3] sm:$0xf]  ;;  %s287_s27 = sshll.u32 %s454_s5, 4  ;;  %s288_s27 = int_to_ptr.vmem [resolvable:$true] %s287_s27 }
  0x2d   :  { %325 = vmatpush3.bf16.msra.mxu0 %v366_v2  ;;  %333 = vmatpush3.bf16.msra.mxu1 %v368_v6  ;;  %s419_s28 = scalar_lea.vmem %s288_s27, 128  ;;  %p424_p3 = scmp.lt.s32.totalorder %s288_s27, %s288_s27 }
  0x2e   :  { %350 = vmatprep.subr.bf16.mxu0 %v451_v0  ;;  %334 = vmatprep.subr.bf16.mxu1 %v451_v0  ;;  %p420_p2 = scmp.ne.s32.totalorder %s288_s27, %s419_s28  ;;  %p425_p4 = scmp.lt.s32.totalorder %s419_s28, %s419_s28 }
  0x30   :  { %327 = vmatmul.mubr.msk.bf16.vlgmr.msra.gmra.mrb[0].mxu0 %vm76_vm1, %v55_v5  ;;  %p426_p5 = por %p425_p4, %p424_p3 }
  0x31   :  { %352 = vmatprep.mubr.msk.bf16.mxu0 %vm452_vm0, %v451_v0  ;;  %335 = vmatpush3.bf16.msra.mxu1 %v369_v7 }
  0x32   :  { %336 = vmatprep.subr.bf16.mxu1 %v451_v0  ;;  %p427_p6 = pnand %p426_p5, %p420_p2 }
  0x35   :  { %337 = vmatpush3.bf16.msra.mxu1 %v370_v8 }
  0x36   :  { %338 = vmatprep.subr.bf16.mxu1 %v451_v0 }
  0x39   :  { %339 = vmatpush3.bf16.msra.mxu1 %v371_v9 }
  0x3a   :  { %340 = vmatprep.subr.bf16.mxu1 %v451_v0 }
  0x3d   :  { %341 = vmatpush3.bf16.msra.mxu1 %v372_v10 }
  0x3e   :  { %342 = vmatprep.subr.bf16.mxu1 %v451_v0 }
  0x41   :  { %343 = vmatpush3.bf16.msra.mxu1 %v373_v11 }
  0x42   :  { %344 = vmatprep.subr.bf16.mxu1 %v451_v0 }
  0x45   :  { %345 = vmatpush3.bf16.msra.mxu1 %v374_v12 }
  0xab   :  { %v237_v37 = vpop.permute.xlu0 %236 }
 0x103   :  { %v114_v18 = vpop.f32.mrb[0].mxu0 }
 0x104   :  { %v115_v19 = vadd.f32 %v114_v18, %v63_v17  ;;  %v328_v20 = vpop.f32.mrb[1].mxu0 }
 0x105   :  { %v117_v21 = vpop.f32.mrb[2].mxu0 }
 0x106   :  { %v120_v22 = vmax.f32 %v115_v19, 0.0  ;;  %v329_v23 = vpop.f32.mrb[3].mxu0 }
 0x108   :  { %v121_v24 = vpack.c.bf16 %v120_v22, %v120_v22 }
 0x10a   :  { %347 = vmatmul.mubr.bf16.vlgmr.msra.gmra.mrb[0].mxu1 %v121_v24 }
 0x1dd   :  { %v224_v29 = vpop.f32.mrb[0].mxu1 }
 0x1de   :  { %v225_v30 = vadd.f32 %v224_v29, %v141_v28  ;;  %v348_v31 = vpop.f32.mrb[1].mxu1 }
 0x1df   :  { %v227_v32 = vpop.f32.mrb[2].mxu1 }
 0x1e0   :  { %v230_v33 = vmax.f32 %v225_v30, 0.0  ;;  %v349_v34 = vpop.f32.mrb[3].mxu1 }
 0x1e2   :  { %v232_v35 = vpack.c.bf16 %v230_v33, %v230_v33 }
 0x1e4   :  { %351 = vmatpush3.bf16.xpose.msra.mxu0 %v232_v35 }
 0x1eb   :  { %353 = vmatmul.mubr.bf16.vlgmr.msra.gmra.mrb[4].mxu0 %v231_v36 }
 0x2be   :  { %v273_v38 = vpop.f32.mrb[4].mxu0 }
 0x2bf   :  { %v274_v39 = vadd.f32 %v273_v38, %v237_v37  ;;  %v354_v40 = vpop.f32.mrb[5].mxu0 }
 0x2c0   :  { %v276_v41 = vpop.f32.mrb[6].mxu0 }
 0x2c1   :  { %v355_v42 = vpop.f32.mrb[7].mxu0  ;;  %280 = vst.msk [vmem:[#allocation7] sm:$0xff] %vm279_vm2, %v274_v39 }
 0x2c2   :  { %430 = shalt.err (!%p427_p6)
}
 0x2c3   :  { %s431_s30 = scalar_lea.hbm %s547_s6, 128 }
 0x2c4   :  { %p432_p7 = scmp.ne.s32.totalorder %s547_s6, %s431_s30  ;;  %p435_p8 = scmp.lt.u32.totalorder %s431_s30, %s547_s6 }
 0x2c6   :  { %p437_p9 = pnand %p435_p8, %p432_p7 }
 0x2c8   :  { %440 = shalt.err (!%p437_p9)
}
 0x2c9   :  { %290 = dma.vmem_to_hbm [thread:$0]  %s288_s27, 128, %s547_s6, [#allocation4]  }
 0x2ca   :  { %445 = dma.done.wait [#allocation4], 128  }
 0x2cb   :  { %446 = vsyncadd [#allocation4], 4294967168 }
 0x2cc   :  { %294 = vsyncpa [#allocation3], 1 }
 0x2cd   :  { %295 = vsyncpa [#allocation6], 1 }
 0x2ce   :  { %296 = vsyncpa [#allocation4], 1 }

</bundles_post_ra>
